<compile_context>
chip_gen: v7x
topology: tpu7x:2x2x1
jax: 0.10.0
libtpu: 0.0.40
codegen_flags: <defaults>
</compile_context>

<pallas_src>
import math
import re

import jax
import jax.numpy as jnp
from jax.experimental import pallas as pl
from jax.experimental.pallas import tpu as pltpu


def _adt_kernel(alpha_ref, x_ref, w_ref, b_ref, o_ref):
    # alpha_ref: (1,) f32 in SMEM; x_ref/o_ref: (BR, BL) block; w_ref/b_ref:
    # (1, BL) f32 affine rows (constant row index -> resident across steps).
    alpha = alpha_ref[0]
    x = x_ref[...].astype(jnp.float32)
    y = jnp.tanh(alpha * x)                       # EUP; hidden behind DMA
    o_ref[...] = (w_ref[...] * y + b_ref[...]).astype(o_ref.dtype)


def _ceil_div(a, b):
    return -(-a // b)


def _round_up(a, m):
    return _ceil_div(a, m) * m


def _tpu_generation():
    try:
        kind = jax.devices()[0].device_kind
    except Exception:
        return 0
    m = re.search(r"(\d+)", kind)
    return int(m.group(1)) if m else 0


# One-time record of whether CORE_PARALLEL compiled on this host (v7x lever);
# falls back to PARALLEL if the current chip/toolchain rejects it.
_CORE_PARALLEL_OK = {"ok": None}


def adaptive_dynamic_tanh(x, alpha_base, weight=None, bias=None, *,
                          target_block_bytes=None):
    """Pallas implementation of AdaptiveDynamicTanh.forward (eval mode).

    x:          (..., D) float32 or bfloat16
    alpha_base: (1,)     scalar parameter
    weight:     (D,)     affine scale (None -> elementwise_affine=False)
    bias:       (D,)     affine shift (None -> elementwise_affine=False)
    """
    orig_shape = x.shape
    dtype = x.dtype
    D = orig_shape[-1]
    total = x.size

    if weight is None:
        weight = jnp.ones((D,), jnp.float32)
    if bias is None:
        bias = jnp.zeros((D,), jnp.float32)

    # ---- generation-aware budgets ------------------------------------------
    gen = _tpu_generation()
    if gen >= 7:
        default_block = 4 * 1024 * 1024        # 3.2 TB/s HBM: amortize step cost
        vmem_limit = 48 * 1024 * 1024          # 64 MiB physical per TC
        want_core_parallel = True              # 2 TensorCores per chip
    elif gen == 6:
        default_block = 4 * 1024 * 1024
        vmem_limit = 64 * 1024 * 1024          # 128 MiB physical
        want_core_parallel = False
    else:                                       # v5e / unknown: stay conservative
        default_block = 2 * 1024 * 1024
        vmem_limit = 32 * 1024 * 1024
        want_core_parallel = False
    if target_block_bytes is None:
        target_block_bytes = default_block

    # ---- lane-dense 2-D view: repack to L = lcm(D, 128) when cheap ---------
    if D % 128 == 0:
        L, rep = D, 1
    else:
        lcm = D * 128 // math.gcd(D, 128)
        if lcm <= 1024 and total % lcm == 0:
            L, rep = lcm, lcm // D             # e.g. D=32->128, 48->384, 96->384
        else:
            L, rep = D, 1                      # lane-sparse fallback (correct, slower)

    x2 = x.reshape(-1, L)
    w2 = jnp.tile(weight.reshape(-1).astype(jnp.float32), rep).reshape(1, L)
    b2 = jnp.tile(bias.reshape(-1).astype(jnp.float32), rep).reshape(1, L)

    rows = x2.shape[0]
    itemsize = jnp.dtype(dtype).itemsize
    sub = max(8, 32 // max(itemsize, 1))       # sublane multiple: 8 f32 / 16 bf16

    # ---- lane-axis blocking guard for very wide rows ------------------------
    row_bytes = L * itemsize
    if sub * row_bytes > target_block_bytes and L % 128 == 0 and L > 128:
        block_l = max(128, (target_block_bytes // (sub * itemsize)) // 128 * 128)
        block_l = min(block_l, L)
    else:
        block_l = L

    # ---- row-block sizing ----------------------------------------------------
    cap = (target_block_bytes // max(block_l * itemsize, 1)) // sub * sub
    cap = max(cap, sub)
    total_bytes = total * itemsize
    if rows > cap:
        block_rows = cap                       # ragged last block masked by Pallas
    elif total_bytes > (1 << 20) and rows > 2 * sub:
        # Mid-size tensor that would otherwise be one grid step: split into ~4
        # blocks so input DMA / compute / output DMA overlap.
        block_rows = min(cap, max(sub, _round_up(_ceil_div(rows, 4), sub)))
    else:
        block_rows = rows                      # full extent -> always legal

    num_r = _ceil_div(rows, block_rows)
    num_l = _ceil_div(L, block_l)

    # v7x: keep the row grid even so both TensorCores get equal work.
    if want_core_parallel and num_r > 1 and num_r % 2 == 1:
        br = max(sub, _round_up(_ceil_div(rows, num_r + 1), sub))
        if br < rows:
            block_rows = br
            num_r = _ceil_div(rows, block_rows)

    alpha = alpha_base.astype(jnp.float32).reshape(1)

    def _run(row_sem):
        return pl.pallas_call(
            _adt_kernel,
            out_shape=jax.ShapeDtypeStruct(x2.shape, dtype),
            grid=(num_r, num_l),
            in_specs=[
                pl.BlockSpec(memory_space=pltpu.MemorySpace.SMEM),        # alpha scalar
                pl.BlockSpec((block_rows, block_l), lambda i, j: (i, j)), # x block
                pl.BlockSpec((1, block_l), lambda i, j: (0, j)),          # weight
                pl.BlockSpec((1, block_l), lambda i, j: (0, j)),          # bias
            ],
            out_specs=pl.BlockSpec((block_rows, block_l), lambda i, j: (i, j)),
            compiler_params=pltpu.CompilerParams(
                dimension_semantics=(row_sem, pltpu.PARALLEL),
                vmem_limit_bytes=vmem_limit,
            ),
        )(alpha, x2, w2, b2)

    if want_core_parallel and _CORE_PARALLEL_OK["ok"] is not False:
        if _CORE_PARALLEL_OK["ok"] is None:
            try:
                out = jax.block_until_ready(_run(pltpu.CORE_PARALLEL))
                _CORE_PARALLEL_OK["ok"] = True
            except Exception:
                _CORE_PARALLEL_OK["ok"] = False
                out = _run(pltpu.PARALLEL)
        else:
            out = _run(pltpu.CORE_PARALLEL)
    else:
        out = _run(pltpu.PARALLEL)

    return out.reshape(orig_shape)


def _ref(x, alpha_base, weight, bias):
    xf = x.astype(jnp.float32)
    y = jnp.tanh(alpha_base.astype(jnp.float32)[0] * xf)
    return (weight.astype(jnp.float32) * y + bias.astype(jnp.float32)).astype(x.dtype)


if __name__ == "__main__":
    # Module config (matches nn.Module __init__ defaults).
    D = 32                       # normalized_shape
    alpha_init_value = 0.5
    alpha_base = jnp.ones((1,), jnp.float32) * alpha_init_value

    key = jax.random.PRNGKey(0)
    k1, k2, k3, k4, k5, k6, k7 = jax.random.split(key, 7)
    weight = jnp.ones((D,), jnp.float32) + 0.1 * jax.random.normal(k1, (D,), jnp.float32)
    bias = jnp.zeros((D,), jnp.float32) + 0.1 * jax.random.normal(k2, (D,), jnp.float32)
    # TODO(synk): compute_alpha()'s adaptive branch and update_grad_norm() are
    # training-time buffer/optimizer-state updates, not part of the eval forward.

    # --- primary check: f32, (batch=2, seq=8, hidden=32), lane-dense repack ---
    x = jax.random.normal(k3, (2, 8, D), jnp.float32)
    out = jax.block_until_ready(adaptive_dynamic_tanh(x, alpha_base, weight, bias))
    assert out.shape == x.shape and out.dtype == x.dtype
    assert jnp.allclose(out, _ref(x, alpha_base, weight, bias), atol=1e-6, rtol=1e-6)

    # --- multi-row-block + ragged tail (tiny block budget forces a grid) ---
    x_big = jax.random.normal(k4, (3, 40, D), jnp.float32)     # rows=30 -> blocks 16 + 14
    out_big = jax.block_until_ready(
        adaptive_dynamic_tanh(x_big, alpha_base, weight, bias, target_block_bytes=8192))
    assert jnp.allclose(out_big, _ref(x_big, alpha_base, weight, bias), atol=1e-6, rtol=1e-6)

    # --- bf16 I/O path (f32 compute inside the kernel) ---
    x_bf16 = x.astype(jnp.bfloat16)
    out_bf16 = jax.block_until_ready(adaptive_dynamic_tanh(x_bf16, alpha_base, weight, bias))
    assert out_bf16.dtype == jnp.bfloat16
    assert jnp.allclose(out_bf16.astype(jnp.float32),
                        _ref(x_bf16, alpha_base, weight, bias).astype(jnp.float32),
                        atol=2e-2, rtol=2e-2)

    # --- generalized lcm repack: D=48 -> L=384 (lane-dense) ---
    D2 = 48
    w48 = jnp.ones((D2,), jnp.float32) + 0.1 * jax.random.normal(k5, (D2,), jnp.float32)
    b48 = 0.1 * jax.random.normal(k6, (D2,), jnp.float32)
    x48 = jax.random.normal(k7, (2, 16, D2), jnp.float32)
    out48 = jax.block_until_ready(adaptive_dynamic_tanh(x48, alpha_base, w48, b48))
    assert jnp.allclose(out48, _ref(x48, alpha_base, w48, b48), atol=1e-5, rtol=1e-5)

    # --- wide-row lane blocking path (2-D grid over rows and lanes) ---
    D3 = 512
    w512 = jnp.ones((D3,), jnp.float32)
    b512 = jnp.zeros((D3,), jnp.float32)
    x512 = jax.random.normal(jax.random.PRNGKey(1), (16, D3), jnp.float32)
    out512 = jax.block_until_ready(
        adaptive_dynamic_tanh(x512, alpha_base, w512, b512, target_block_bytes=8192))
    assert jnp.allclose(out512, _ref(x512, alpha_base, w512, b512), atol=1e-5, rtol=1e-5)

    # --- mid-size tensor: exercises the >=4-step pipelining split ---
    x_mid = jax.random.normal(jax.random.PRNGKey(2), (320, 1024), jnp.float32)  # 1.25 MiB
    w_mid = jnp.ones((1024,), jnp.float32)
    b_mid = jnp.zeros((1024,), jnp.float32)
    out_mid = jax.block_until_ready(adaptive_dynamic_tanh(x_mid, alpha_base, w_mid, b_mid))
    assert jnp.allclose(out_mid, _ref(x_mid, alpha_base, w_mid, b_mid), atol=1e-5, rtol=1e-5)

    print("KERNEL_OK")
</pallas_src>

<mosaic_0001>
module attributes {stable_mosaic.version = 11 : i64} {
  func.func @_adt_kernel(%arg0: i32, %arg1: i32, %arg2: memref<1xf32, #tpu.memory_space<smem>>, %arg3: memref<4x128xf32, #tpu.memory_space<vmem>>, %arg4: memref<1x128xf32, #tpu.memory_space<vmem>>, %arg5: memref<1x128xf32, #tpu.memory_space<vmem>>, %arg6: memref<4x128xf32, #tpu.memory_space<vmem>>) attributes {dimension_semantics = [#tpu.dimension_semantics<parallel>, #tpu.dimension_semantics<parallel>], iteration_bounds = array<i64: 1, 1>, scalar_prefetch = 0 : i64, scratch_operands = 0 : i64, tpu.core_type = #tpu.core_type<tc>, window_params = [{transform_indices = @transform_0, window_bounds = array<i64: 1>}, {transform_indices = @transform_1, window_bounds = array<i64: 4, 128>}, {transform_indices = @transform_2, window_bounds = array<i64: 1, 128>}, {transform_indices = @transform_3, window_bounds = array<i64: 1, 128>}, {transform_indices = @transform_4, window_bounds = array<i64: 4, 128>}]} {
    %c0 = arith.constant 0 : index
    %0 = memref.load %arg2[%c0] : memref<1xf32, #tpu.memory_space<smem>>
    %c0_0 = arith.constant 0 : index
    %c0_1 = arith.constant 0 : index
    %1 = vector.load %arg3[%c0_0, %c0_1] : memref<4x128xf32, #tpu.memory_space<vmem>>, vector<4x128xf32>
    %2 = vector.broadcast %0 : f32 to vector<4x128xf32>
    %3 = arith.mulf %2, %1 : vector<4x128xf32>
    %4 = math.tanh %3 : vector<4x128xf32>
    %c0_2 = arith.constant 0 : index
    %c0_3 = arith.constant 0 : index
    %5 = vector.load %arg4[%c0_2, %c0_3] : memref<1x128xf32, #tpu.memory_space<vmem>>, vector<1x128xf32>
    %6 = vector.broadcast %5 : vector<1x128xf32> to vector<4x128xf32>
    %7 = arith.mulf %6, %4 : vector<4x128xf32>
    %c0_4 = arith.constant 0 : index
    %c0_5 = arith.constant 0 : index
    %8 = vector.load %arg5[%c0_4, %c0_5] : memref<1x128xf32, #tpu.memory_space<vmem>>, vector<1x128xf32>
    %9 = vector.broadcast %8 : vector<1x128xf32> to vector<4x128xf32>
    %10 = arith.addf %7, %9 : vector<4x128xf32>
    %c0_6 = arith.constant 0 : index
    %c0_7 = arith.constant 0 : index
    %11 = vector.load %arg6[%c0_6, %c0_7] : memref<4x128xf32, #tpu.memory_space<vmem>>, vector<4x128xf32>
    tpu.vector_store %arg6[%c0_6, %c0_7], %10 {strides = array<i32>} : memref<4x128xf32, #tpu.memory_space<vmem>>, vector<4x128xf32>,
    return
  }
  func.func @transform_0(%arg0: i32, %arg1: i32) -> i32 {
    %c0_i32 = arith.constant 0 : i32
    %c0_i32_0 = arith.constant 0 : i32
    return %c0_i32 : i32
  }
  func.func @transform_1(%arg0: i32, %arg1: i32) -> (i32, i32) {
    %c0_i32 = arith.constant 0 : i32
    return %arg0, %arg1 : i32, i32
  }
  func.func @transform_2(%arg0: i32, %arg1: i32) -> (i32, i32) {
    %c0_i32 = arith.constant 0 : i32
    %c0_i32_0 = arith.constant 0 : i32
    return %c0_i32, %arg1 : i32, i32
  }
  func.func @transform_3(%arg0: i32, %arg1: i32) -> (i32, i32) {
    %c0_i32 = arith.constant 0 : i32
    %c0_i32_0 = arith.constant 0 : i32
    return %c0_i32, %arg1 : i32, i32
  }
  func.func @transform_4(%arg0: i32, %arg1: i32) -> (i32, i32) {
    %c0_i32 = arith.constant 0 : i32
    return %arg0, %arg1 : i32, i32
  }
}

</mosaic_0001>

<bundles_post_ra>
// kernel: tpu_custom_call.1
= control target key start
LH: loop header
LB: loop body
LE: loop exit
PB: predicated region body
PF: predicated region fallthrough
CT: control target
= control target key end

     0   :  { %10 = vsyncpa [#allocation4], 0  ;;  %s182_s0 = inlined_call_operand.<no memory space> [shape: f32[1], index: 0, kind: input, shape index: {}]   ;;  %s183_s1 = inlined_call_operand.hbm [shape: f32[4,128], index: 1, kind: input, shape index: {}]   ;;  %s184_s2 = inlined_call_operand.vmem [shape: f32[1,128], index: 2, kind: input, shape index: {}]   ;;  %s185_s3 = inlined_call_operand.vmem [shape: f32[1,128], index: 3, kind: input, shape index: {}]   ;;  %s186_s4 = inlined_call_operand.hbm [shape: f32[4,128], index: 4, kind: output, shape index: {}]  }
   0x1   :  { %11 = vsyncpa [#allocation5], 0  ;;  %s122_s15 = smov [#allocation3]   ;;  %s74_s19 = scalar_lea.hbm %s183_s1, 64 }
   0x2   :  { %s20_s16 = sshll.u32 %s122_s15, 4  ;;  %p75_p0 = scmp.ne.s32.totalorder %s183_s1, %s74_s19  ;;  %s21_s16 = int_to_ptr.vmem [resolvable:$true] %s20_s16 }
   0x3   :  { %p78_p1 = scmp.lt.u32.totalorder %s74_s19, %s183_s1 }
   0x5   :  { %p80_p2 = pnand %p78_p1, %p75_p0 }
   0x7   :  { %83 = shalt.err (!%p80_p2)
}
   0x8   :  { %s84_s24 = scalar_lea.vmem %s21_s16, 64  ;;  %p89_p4 = scmp.lt.s32.totalorder %s21_s16, %s21_s16 }
   0x9   :  { %p85_p3 = scmp.ne.s32.totalorder %s21_s16, %s84_s24  ;;  %p90_p5 = scmp.lt.s32.totalorder %s84_s24, %s84_s24 }
   0xb   :  { %p91_p6 = por %p90_p5, %p89_p4 }
   0xd   :  { %p92_p7 = pnand %p91_p6, %p85_p3 }
   0xf   :  { %95 = shalt.err (!%p92_p7)
}
  0x10   :  { %23 = dma.hbm_to_vmem [thread:$0]  %s183_s1, 64, %s21_s16, [#allocation4]  }
  0x11   :  { %118 = dma.done.wait [#allocation4], 64  }
  0x12   :  { %119 = vsyncadd [#allocation4], 4294967232  ;;  %v33_v0 = vstv %s182_s0  ;;  %v32_v1 = vld [vmem:[#allocation3] sm:$0xf]  ;;  %s123_s7 = smov [#allocation6]  }
  0x13   :  { %v34_v2 = vmul.f32 %v33_v0, %v32_v1  ;;  %v68_v3 = vld [vmem:[%s184_s2] ss:$0 sm:$0xff]  ;;  %s59_s1 = sshll.u32 %s123_s7, 4  ;;  %s60_s1 = int_to_ptr.vmem [resolvable:$true] %s59_s1 }
  0x14   :  { %v69_v5 = vld [vmem:[%s185_s3] ss:$0 sm:$0xff]  ;;  %s96_s8 = scalar_lea.vmem %s60_s1, 64  ;;  %p101_p9 = scmp.lt.s32.totalorder %s60_s1, %s60_s1 }
  0x15   :  { %72 = vtanh.f32 %v34_v2  ;;  %p97_p8 = scmp.ne.s32.totalorder %s60_s1, %s96_s8  ;;  %p102_p10 = scmp.lt.s32.totalorder %s96_s8, %s96_s8 }
  0x17   :  { %p103_p11 = por %p102_p10, %p101_p9 }
  0x19   :  { %p104_p12 = pnand %p103_p11, %p97_p8 }
  0x1f   :  { %v73_v4 = vpop.eup %72 }
  0x20   :  { %v43_v6 = vmul.f32 %v73_v4, %v68_v3 }
  0x22   :  { %v51_v7 = vadd.f32 %v69_v5, %v43_v6 }
  0x24   :  { %52 = vst [vmem:[#allocation6] sm:$0xf] %v51_v7 }
  0x25   :  { %107 = shalt.err (!%p104_p12)
}
  0x26   :  { %s108_s9 = scalar_lea.hbm %s186_s4, 64 }
  0x27   :  { %p109_p13 = scmp.ne.s32.totalorder %s186_s4, %s108_s9  ;;  %p112_p0 = scmp.lt.u32.totalorder %s108_s9, %s186_s4 }
  0x29   :  { %p114_p1 = pnand %p112_p0, %p109_p13 }
  0x2b   :  { %117 = shalt.err (!%p114_p1)
}
  0x2c   :  { %62 = dma.vmem_to_hbm [thread:$0]  %s60_s1, 64, %s186_s4, [#allocation5]  }
  0x2d   :  { %120 = dma.done.wait [#allocation5], 64  }
  0x2e   :  { %121 = vsyncadd [#allocation5], 4294967232 }
  0x2f   :  { %66 = vsyncpa [#allocation4], 1 }
  0x30   :  { %67 = vsyncpa [#allocation5], 1 }

</bundles_post_ra>
